<compile_context>
chip_gen: v5e
topology: v5e:2x2
jax: 0.10.0
libtpu: 0.0.40
codegen_flags: <defaults>
</compile_context>

<pallas_src>
import functools

import jax
import jax.numpy as jnp
from jax.experimental import pallas as pl
from jax.experimental.pallas import tpu as pltpu


def _psnr_kernel(x_ref, y_ref, o_ref, max_sc, ssq_sc, *,
                 num_features, tf, ragged):
    """Grid = (batch blocks ['parallel'], feature chunks ['arbitrary'])."""
    f = pl.program_id(1)

    x = x_ref[...].astype(jnp.float32)   # (TB, TF)
    y = y_ref[...].astype(jnp.float32)   # (TB, TF)
    d = x - y

    if ragged:
        # Mask out-of-range feature columns (only the last chunk is ragged;
        # the mask is all-true elsewhere).  Fill = -inf for the max path,
        # 0 for the squared-error path.  ~2 extra VPU ops per vreg, fully
        # hidden under the HBM DMA.
        col = jax.lax.broadcasted_iota(jnp.int32, x.shape, 1) + f * tf
        valid = col < num_features
        x_for_max = jnp.where(valid, x, -jnp.inf)
        sq = jnp.where(valid, d * d, 0.0)
    else:
        x_for_max = x
        sq = d * d

    chunk_max = jnp.max(x_for_max, axis=1, keepdims=True)   # (TB, 1)
    chunk_ssq = jnp.sum(sq, axis=1, keepdims=True)           # (TB, 1)

    @pl.when(f == 0)
    def _():
        max_sc[...] = chunk_max
        ssq_sc[...] = chunk_ssq

    @pl.when(f > 0)
    def _():
        max_sc[...] = jnp.maximum(max_sc[...], chunk_max)
        ssq_sc[...] = ssq_sc[...] + chunk_ssq

    @pl.when(f == pl.num_programs(1) - 1)
    def _():
        mse = ssq_sc[...] * (1.0 / float(num_features))
        # NOTE: log10(max) is NaN/-inf when the per-sample max <= 0 -- same
        # behavior as the PyTorch reference (skimage-style PSNR).
        o_ref[...] = 20.0 * jnp.log10(max_sc[...]) - 10.0 * jnp.log10(mse)


def psnr_loss(input_data, target_data, reduction: str = "mean", *,
              target_block_bytes: int = 4 * 1024 * 1024):
    """Pallas equivalent of PSNRLoss.forward / batch_psnr."""
    if reduction not in ("mean", "sum", "none"):
        raise ValueError(
            f"Reduction is either `mean`, `sum` or `none`. Got {reduction}."
        )
    assert input_data.shape == target_data.shape
    batch_size = input_data.shape[0]

    # Keep native dtype; the kernel upcasts to f32 per tile.
    x = input_data.reshape(batch_size, -1)
    y = target_data.reshape(batch_size, -1)
    num_features = x.shape[1]

    itemsize = max(jnp.dtype(x.dtype).itemsize, jnp.dtype(y.dtype).itemsize)
    # Native packed sublane tile: f32 -> 8, bf16/f16 -> 16, int8/fp8 -> 32.
    sub = max(8, 32 // itemsize)

    # ---- batch tile --------------------------------------------------------
    # Partial tail blocks are fine (clipped DMA reads, masked output writes),
    # so no batch padding is ever needed.
    if batch_size <= sub:
        tb = batch_size                       # block dim == full array dim
    else:
        tb = sub
        row_bytes = num_features * itemsize
        # Grow TB (up to 4x the packed tile) while a full-row block is still
        # well under the bandwidth-optimal ~4 MiB, but keep >= 2 batch blocks
        # so the "parallel" axis can shard across v7x's 2 TensorCores.
        while (tb < 4 * sub and batch_size >= 4 * tb
               and tb * row_bytes < target_block_bytes):
            tb *= 2

    # ---- feature tile ------------------------------------------------------
    # Largest multiple of 128 lanes such that one input block stays under
    # target_block_bytes; a single full-width chunk when F is small.
    max_tf = max(128, (target_block_bytes // (tb * itemsize)) // 128 * 128)
    if num_features <= max_tf:
        tf, n_f, ragged = num_features, 1, False
    else:
        tf = max_tf
        n_f = pl.cdiv(num_features, tf)
        ragged = (num_features % tf) != 0

    kernel = functools.partial(_psnr_kernel, num_features=num_features,
                               tf=tf, ragged=ragged)

    out = pl.pallas_call(
        kernel,
        out_shape=jax.ShapeDtypeStruct((batch_size, 1), jnp.float32),
        grid_spec=pltpu.PrefetchScalarGridSpec(
            num_scalar_prefetch=0,
            grid=(pl.cdiv(batch_size, tb), n_f),
            in_specs=[
                pl.BlockSpec((tb, tf), lambda b, f: (b, f)),
                pl.BlockSpec((tb, tf), lambda b, f: (b, f)),
            ],
            out_specs=pl.BlockSpec((tb, 1), lambda b, f: (b, 0)),
            scratch_shapes=[
                pltpu.VMEM((tb, 1), jnp.float32),   # running per-row max
                pltpu.VMEM((tb, 1), jnp.float32),   # running per-row sum(d^2)
            ],
        ),
        compiler_params=pltpu.CompilerParams(
            # Batch axis has no cross-step carry -> parallel (v7x 2-TC
            # sharding); the feature axis carries the running reductions.
            dimension_semantics=("parallel", "arbitrary"),
            # 2 inputs x 2 buffers x <=4 MiB blocks: raise v5e's 16 MiB
            # default scoped limit; 32 MiB is safe on v5e/v6e/v7x.
            vmem_limit_bytes=32 * 1024 * 1024,
        ),
    )(x, y)

    psnrs = out[:, 0]
    if reduction == "mean":
        return psnrs.mean()
    if reduction == "sum":
        return psnrs.sum()
    return psnrs


def _psnr_reference(input_data, target_data, reduction="mean"):
    b = input_data.shape[0]
    x = input_data.reshape(b, -1).astype(jnp.float32)
    y = target_data.reshape(b, -1).astype(jnp.float32)
    maximum_value = jnp.max(x, axis=1)
    mse = jnp.mean((x - y) ** 2, axis=1)
    psnrs = 20.0 * jnp.log10(maximum_value) - 10.0 * jnp.log10(mse)
    if reduction == "mean":
        return psnrs.mean()
    if reduction == "sum":
        return psnrs.sum()
    return psnrs


if __name__ == "__main__":
    key = jax.random.PRNGKey(0)
    k1, k2, k3, k4 = jax.random.split(key, 4)

    # Primary test: small NCHW images, mean reduction.
    B, C, H, W = 2, 4, 16, 16
    input_data = jax.random.uniform(k1, (B, C, H, W), jnp.float32, 0.5, 1.5)
    noise = 0.05 * jax.random.normal(k2, (B, C, H, W), jnp.float32)
    target_data = input_data + noise

    out = jax.block_until_ready(psnr_loss(input_data, target_data, reduction="mean"))
    ref = _psnr_reference(input_data, target_data, reduction="mean")
    assert jnp.allclose(out, ref, rtol=1e-3, atol=1e-3), (out, ref)

    # Secondary test: exercises the partial batch block (B=10, TB=8 -> 2
    # blocks, last with 2 valid rows), the ragged feature tail (F=300 -> 3
    # chunks of 128, last with 44 valid lanes) and the multi-chunk carry.
    B2, C2, H2, W2 = 10, 1, 10, 30
    x2 = jax.random.uniform(k3, (B2, C2, H2, W2), jnp.float32, 0.5, 1.5)
    y2 = x2 + 0.05 * jax.random.normal(k4, (B2, C2, H2, W2), jnp.float32)
    for red in ("mean", "sum", "none"):
        o = jax.block_until_ready(
            psnr_loss(x2, y2, reduction=red, target_block_bytes=4096))
        r = _psnr_reference(x2, y2, reduction=red)
        assert jnp.allclose(o, r, rtol=1e-3, atol=1e-3), (red, o, r)

    # bf16 inputs: TB follows the packed (16,128) tile (here TB = B = 10),
    # native 2 B/elem HBM reads, f32 accumulation in-kernel.
    xb = x2.astype(jnp.bfloat16)
    yb = y2.astype(jnp.bfloat16)
    ob = jax.block_until_ready(
        psnr_loss(xb, yb, reduction="none", target_block_bytes=4096))
    rb = _psnr_reference(xb, yb, reduction="none")
    assert jnp.allclose(ob, rb, rtol=1e-3, atol=1e-2), (ob, rb)

    print("KERNEL_OK")
</pallas_src>

<mosaic_0001>
module attributes {stable_mosaic.version = 11 : i64} {
  func.func @_psnr_kernel(%arg0: i32, %arg1: i32, %arg2: memref<2x1024xf32, #tpu.memory_space<vmem>>, %arg3: memref<2x1024xf32, #tpu.memory_space<vmem>>, %arg4: memref<2x1xf32, #tpu.memory_space<vmem>>, %arg5: memref<2x1xf32, #tpu.memory_space<vmem>>, %arg6: memref<2x1xf32, #tpu.memory_space<vmem>>) attributes {dimension_semantics = [#tpu.dimension_semantics<parallel>, #tpu.dimension_semantics<arbitrary>], iteration_bounds = array<i64: 1, 1>, scalar_prefetch = 0 : i64, scratch_operands = 2 : i64, tpu.core_type = #tpu.core_type<tc>, window_params = [{transform_indices = @transform_0, window_bounds = array<i64: 2, 1024>}, {transform_indices = @transform_1, window_bounds = array<i64: 2, 1024>}, {transform_indices = @transform_2, window_bounds = array<i64: 2, 1>}]} {
    %c0 = arith.constant 0 : index
    %c0_0 = arith.constant 0 : index
    %0 = vector.load %arg2[%c0, %c0_0] : memref<2x1024xf32, #tpu.memory_space<vmem>>, vector<2x1024xf32>
    %c0_1 = arith.constant 0 : index
    %c0_2 = arith.constant 0 : index
    %1 = vector.load %arg3[%c0_1, %c0_2] : memref<2x1024xf32, #tpu.memory_space<vmem>>, vector<2x1024xf32>
    %2 = arith.subf %0, %1 : vector<2x1024xf32>
    %3 = arith.mulf %2, %2 : vector<2x1024xf32>
    %cst = arith.constant dense<0xFF800000> : vector<2xf32>
    %4 = vector.multi_reduction <maximumf>, %0, %cst [1] : vector<2x1024xf32> to vector<2xf32>
    %5 = vector.shape_cast %4 : vector<2xf32> to vector<2x1xf32>
    %cst_3 = arith.constant dense<0.000000e+00> : vector<2xf32>
    %6 = vector.multi_reduction <add>, %3, %cst_3 [1] : vector<2x1024xf32> to vector<2xf32>
    %7 = vector.shape_cast %6 : vector<2xf32> to vector<2x1xf32>
    %c0_i32 = arith.constant 0 : i32
    %8 = arith.cmpi eq, %arg1, %c0_i32 : i32
    %9 = arith.extui %8 : i1 to i32
    %c0_i32_4 = arith.constant 0 : i32
    %10 = arith.cmpi ne, %9, %c0_i32_4 : i32
    scf.if %10 {
      %c0_9 = arith.constant 0 : index
      %c0_10 = arith.constant 0 : index
      %17 = vector.load %arg5[%c0_9, %c0_10] : memref<2x1xf32, #tpu.memory_space<vmem>>, vector<2x1xf32>
      tpu.vector_store %arg5[%c0_9, %c0_10], %5 {strides = array<i32>} : memref<2x1xf32, #tpu.memory_space<vmem>>, vector<2x1xf32>,
      %c0_11 = arith.constant 0 : index
      %c0_12 = arith.constant 0 : index
      %18 = vector.load %arg6[%c0_11, %c0_12] : memref<2x1xf32, #tpu.memory_space<vmem>>, vector<2x1xf32>
      tpu.vector_store %arg6[%c0_11, %c0_12], %7 {strides = array<i32>} : memref<2x1xf32, #tpu.memory_space<vmem>>, vector<2x1xf32>,
    } else {
    }
    %c0_i32_5 = arith.constant 0 : i32
    %11 = arith.cmpi sgt, %arg1, %c0_i32_5 : i32
    %12 = arith.extui %11 : i1 to i32
    %c0_i32_6 = arith.constant 0 : i32
    %13 = arith.cmpi ne, %12, %c0_i32_6 : i32
    scf.if %13 {
      %c0_9 = arith.constant 0 : index
      %c0_10 = arith.constant 0 : index
      %17 = vector.load %arg5[%c0_9, %c0_10] : memref<2x1xf32, #tpu.memory_space<vmem>>, vector<2x1xf32>
      %18 = arith.maximumf %17, %5 : vector<2x1xf32>
      %c0_11 = arith.constant 0 : index
      %c0_12 = arith.constant 0 : index
      %19 = vector.load %arg5[%c0_11, %c0_12] : memref<2x1xf32, #tpu.memory_space<vmem>>, vector<2x1xf32>
      tpu.vector_store %arg5[%c0_11, %c0_12], %18 {strides = array<i32>} : memref<2x1xf32, #tpu.memory_space<vmem>>, vector<2x1xf32>,
      %c0_13 = arith.constant 0 : index
      %c0_14 = arith.constant 0 : index
      %20 = vector.load %arg6[%c0_13, %c0_14] : memref<2x1xf32, #tpu.memory_space<vmem>>, vector<2x1xf32>
      %21 = arith.addf %20, %7 : vector<2x1xf32>
      %c0_15 = arith.constant 0 : index
      %c0_16 = arith.constant 0 : index
      %22 = vector.load %arg6[%c0_15, %c0_16] : memref<2x1xf32, #tpu.memory_space<vmem>>, vector<2x1xf32>
      tpu.vector_store %arg6[%c0_15, %c0_16], %21 {strides = array<i32>} : memref<2x1xf32, #tpu.memory_space<vmem>>, vector<2x1xf32>,
    } else {
    }
    %c0_i32_7 = arith.constant 0 : i32
    %14 = arith.cmpi eq, %arg1, %c0_i32_7 : i32
    %15 = arith.extui %14 : i1 to i32
    %c0_i32_8 = arith.constant 0 : i32
    %16 = arith.cmpi ne, %15, %c0_i32_8 : i32
    scf.if %16 {
      %c0_9 = arith.constant 0 : index
      %c0_10 = arith.constant 0 : index
      %17 = vector.load %arg6[%c0_9, %c0_10] : memref<2x1xf32, #tpu.memory_space<vmem>>, vector<2x1xf32>
      %cst_11 = arith.constant 9.765625E-4 : f32
      %18 = vector.broadcast %cst_11 : f32 to vector<2x1xf32>
      %19 = arith.mulf %17, %18 : vector<2x1xf32>
      %c0_12 = arith.constant 0 : index
      %c0_13 = arith.constant 0 : index
      %20 = vector.load %arg5[%c0_12, %c0_13] : memref<2x1xf32, #tpu.memory_space<vmem>>, vector<2x1xf32>
      %21 = math.log %20 : vector<2x1xf32>
      %cst_14 = arith.constant 0.434294492 : f32
      %22 = vector.broadcast %cst_14 : f32 to vector<2x1xf32>
      %23 = arith.mulf %21, %22 : vector<2x1xf32>
      %cst_15 = arith.constant 2.000000e+01 : f32
      %24 = vector.broadcast %cst_15 : f32 to vector<2x1xf32>
      %25 = arith.mulf %24, %23 : vector<2x1xf32>
      %26 = math.log %19 : vector<2x1xf32>
      %cst_16 = arith.constant 0.434294492 : f32
      %27 = vector.broadcast %cst_16 : f32 to vector<2x1xf32>
      %28 = arith.mulf %26, %27 : vector<2x1xf32>
      %cst_17 = arith.constant 1.000000e+01 : f32
      %29 = vector.broadcast %cst_17 : f32 to vector<2x1xf32>
      %30 = arith.mulf %29, %28 : vector<2x1xf32>
      %31 = arith.subf %25, %30 : vector<2x1xf32>
      %c0_18 = arith.constant 0 : index
      %c0_19 = arith.constant 0 : index
      %32 = vector.load %arg4[%c0_18, %c0_19] : memref<2x1xf32, #tpu.memory_space<vmem>>, vector<2x1xf32>
      tpu.vector_store %arg4[%c0_18, %c0_19], %31 {strides = array<i32>} : memref<2x1xf32, #tpu.memory_space<vmem>>, vector<2x1xf32>,
    } else {
    }
    return
  }
  func.func @transform_0(%arg0: i32, %arg1: i32) -> (i32, i32) {
    %c0_i32 = arith.constant 0 : i32
    return %arg0, %arg1 : i32, i32
  }
  func.func @transform_1(%arg0: i32, %arg1: i32) -> (i32, i32) {
    %c0_i32 = arith.constant 0 : i32
    return %arg0, %arg1 : i32, i32
  }
  func.func @transform_2(%arg0: i32, %arg1: i32) -> (i32, i32) {
    %c0_i32 = arith.constant 0 : i32
    %c0_i32_0 = arith.constant 0 : i32
    return %arg0, %c0_i32 : i32, i32
  }
}

</mosaic_0001>

<bundles_post_ra>
// kernel: tpu_custom_call.1
= control target key start
LH: loop header
LB: loop body
LE: loop exit
PB: predicated region body
PF: predicated region fallthrough
CT: control target
= control target key end

     0   :  { %7 = vsyncpa [#allocation5], 0  ;;  %s268_s0 = inlined_call_operand.hbm [shape: f32[2,1024], index: 0, kind: input, shape index: {}]   ;;  %s269_s1 = inlined_call_operand.hbm [shape: f32[2,1024], index: 1, kind: input, shape index: {}]   ;;  %s270_s2 = inlined_call_operand.vmem [shape: f32[2,1], index: 2, kind: output, shape index: {}]  }
   0x1   :  { %s14_s11 = sshll.u32 %s268_s0, 4  ;;  %s15_s11 = int_to_ptr.hbm [resolvable:$true] %s14_s11 }
   0x2   :  { %8 = vsyncpa [#allocation7], 0  ;;  %s223_s12 = smov [#allocation4]   ;;  %s25_s16 = sshll.u32 %s269_s1, 4  ;;  %s26_s16 = int_to_ptr.hbm [resolvable:$true] %s25_s16 }
   0x3   :  { %s16_s13 = sshll.u32 %s223_s12, 4  ;;  %s224_s17 = smov [#allocation6]   ;;  %s17_s13 = int_to_ptr.vmem [resolvable:$true] %s16_s13 }
   0x4   :  { %19 = dma.hbm_to_vmem [thread:$0]  %s15_s11, 256, %s17_s13, [#allocation5]  }
   0x5   :  { %s27_s18 = sshll.u32 %s224_s17, 4  ;;  %s28_s18 = int_to_ptr.vmem [resolvable:$true] %s27_s18 }
   0x6   :  { %30 = dma.hbm_to_vmem [thread:$0]  %s26_s16, 256, %s28_s18, [#allocation7]  }
   0x7   :  { %219 = dma.done.wait [#allocation5], 256  }
   0x8   :  { %220 = vsyncadd [#allocation5], 4294967040 }
   0x9   :  { %221 = dma.done.wait [#allocation7], 256  }
   0xa   :  { %222 = vsyncadd [#allocation7], 4294967040  ;;  %v39_v0 = vld [vmem:[#allocation4] sm:$0xff]  ;;  %v40_v1 = vld [vmem:[#allocation4 + $0x8] sm:$0xff]  ;;  %vm68_vm0 = vcmask 1041408   ;;  %vm128_vm1 = vcmask 1024  }
   0xb   :  { %v41_v2 = vld [vmem:[#allocation6] sm:$0xff]  ;;  %49 = vst [vmem:[#allocation1] ss:$4 sm:$0xff] %v39_v0  ;;  %v42_v3 = vld [vmem:[#allocation6 + $0x8] sm:$0xff] }
   0xc   :  { %51 = vst [vmem:[#allocation1 + $0x20] ss:$4 sm:$0xff] %v40_v1  ;;  %v43_v4 = vsub.f32 %v39_v0, %v41_v2  ;;  %v44_v5 = vsub.f32 %v40_v1, %v42_v3 }
   0xe   :  { %v45_v6 = vmul.f32 %v43_v4, %v43_v4  ;;  %v46_v9 = vmul.f32 %v44_v5, %v44_v5 }
  0x12   :  { %v52_v7 = vld.sshfl [vmem:[#allocation1] sm:$0xff pattern:$0x73625140]  ;;  %v53_v8 = vld.sshfl [vmem:[#allocation1 + $0x8] sm:$0xff pattern:$0x73625140] }
  0x13   :  { %v54_v10 = vld.sshfl [vmem:[#allocation1 + $0x10] sm:$0xff pattern:$0x73625140]  ;;  %v55_v11 = vld.sshfl [vmem:[#allocation1 + $0x18] sm:$0xff pattern:$0x73625140] }
  0x14   :  { %v56_v12 = vld.sshfl [vmem:[#allocation1 + $0x20] sm:$0xff pattern:$0x73625140]  ;;  %v57_v13 = vld.sshfl [vmem:[#allocation1 + $0x28] sm:$0xff pattern:$0x73625140] }
  0x15   :  { %v58_v14 = vld.sshfl [vmem:[#allocation1 + $0x30] sm:$0xff pattern:$0x73625140]  ;;  %v59_v15 = vld.sshfl [vmem:[#allocation1 + $0x38] sm:$0xff pattern:$0x73625140] }
  0x16   :  { %88 = vst [vmem:[#allocation1] ss:$4 sm:$0xff] %v45_v6  ;;  %v69_v32 = vsel %vm68_vm0, %v52_v7, -inf  ;;  %v70_v33 = vsel %vm68_vm0, %v53_v8, -inf  ;;  %v71_v36 = vsel %vm68_vm0, %v54_v10, -inf  ;;  %v72_v37 = vsel %vm68_vm0, %v55_v11, -inf }
  0x17   :  { %90 = vst [vmem:[#allocation1 + $0x20] ss:$4 sm:$0xff] %v46_v9  ;;  %v73_v38 = vsel %vm68_vm0, %v56_v12, -inf  ;;  %v75_v40 = vsel %vm68_vm0, %v57_v13, -inf  ;;  %v77_v41 = vsel %vm68_vm0, %v58_v14, -inf  ;;  %v79_v42 = vsel %vm68_vm0, %v59_v15, -inf }
  0x18   :  { %v74_v45 = vmax.f32 %v69_v32, %v73_v38  ;;  %v76_v47 = vmax.f32 %v70_v33, %v75_v40  ;;  %v78_v48 = vmax.f32 %v71_v36, %v77_v41  ;;  %v80_v49 = vmax.f32 %v72_v37, %v79_v42 }
  0x1a   :  { %v81_v51 = vmax.f32 %v74_v45, %v76_v47  ;;  %v82_v52 = vmax.f32 %v78_v48, %v80_v49 }
  0x1c   :  { %v83_v53 = vmax.f32 %v81_v51, %v82_v52 }
  0x1d   :  { %v91_v16 = vld.sshfl [vmem:[#allocation1] sm:$0xff pattern:$0x73625140]  ;;  %v92_v17 = vld.sshfl [vmem:[#allocation1 + $0x8] sm:$0xff pattern:$0x73625140] }
  0x1e   :  { %v93_v18 = vld.sshfl [vmem:[#allocation1 + $0x10] sm:$0xff pattern:$0x73625140]  ;;  %v94_v19 = vld.sshfl [vmem:[#allocation1 + $0x18] sm:$0xff pattern:$0x73625140] }
  0x1f   :  { %v107_v20 = vsel %vm68_vm0, %v91_v16, 0.0  ;;  %v108_v21 = vsel %vm68_vm0, %v92_v17, 0.0  ;;  %v110_v22 = vsel %vm68_vm0, %v93_v18, 0.0  ;;  %v95_v23 = vld.sshfl [vmem:[#allocation1 + $0x20] sm:$0xff pattern:$0x73625140] }
  0x20   :  { %v109_v24 = vadd.f32 %v108_v21, %v107_v20  ;;  %v112_v25 = vsel %vm68_vm0, %v94_v19, 0.0  ;;  %v96_v26 = vld.sshfl [vmem:[#allocation1 + $0x28] sm:$0xff pattern:$0x73625140]  ;;  %v114_v28 = vsel %vm68_vm0, %v95_v23, 0.0 }
  0x21   :  { %v97_v29 = vld.sshfl [vmem:[#allocation1 + $0x30] sm:$0xff pattern:$0x73625140]  ;;  %v116_v31 = vsel %vm68_vm0, %v96_v26, 0.0 }
  0x22   :  { %v111_v27 = vadd.f32 %v110_v22, %v109_v24  ;;  %v98_v34 = vld.sshfl [vmem:[#allocation1 + $0x38] sm:$0xff pattern:$0x73625140]  ;;  %v118_v39 = vsel %vm68_vm0, %v97_v29, 0.0 }
  0x23   :  { %v120_v44 = vsel %vm68_vm0, %v98_v34, 0.0 }
  0x24   :  { %v113_v30 = vadd.f32 %v112_v25, %v111_v27 }
  0x26   :  { %v115_v35 = vadd.f32 %v114_v28, %v113_v30 }
  0x28   :  { %v117_v43 = vadd.f32 %v116_v31, %v115_v35 }
  0x2a   :  { %v119_v46 = vadd.f32 %v118_v39, %v117_v43 }
  0x2c   :  { %v121_v50 = vadd.f32 %v120_v44, %v119_v46 }
  0x2e   :  { %122 = vadd.xlane.f32.xlu0 %v121_v50 }
  0x36   :  { %84 = vmax.xlane.f32.xlu0 %v83_v53 }
  0xa1   :  { %v123_v54 = vpop.xlane.xlu0 %122 }
  0xa2   :  { %130 = vst.msk [vmem:[#allocation3] sm:$0x3] %vm128_vm1, %v123_v54 }
  0xa9   :  { %v145_v55 = vld [vmem:[#allocation3] sm:$0x3]  ;;  %v85_v56 = vpop.xlane.xlu0 %84 }
  0xaa   :  { %v146_v57 = vmul.f32 0.0009765625, %v145_v55  ;;  %129 = vst.msk [vmem:[#allocation2] sm:$0x3] %vm128_vm1, %v85_v56 }
  0xac   :  { %167 = vlog2.f32 %v146_v57 }
  0xb1   :  { %v147_v58 = vld [vmem:[#allocation2] sm:$0x3] }
  0xb2   :  { %v168_v59 = vpop.eup %167  ;;  %169 = vlog2.f32 %v147_v58 }
  0xb3   :  { %v153_v60 = vmul.f32 0.6931472, %v168_v59 }
  0xb5   :  { %v154_v62 = vmul.f32 0.4342945, %v153_v60 }
  0xb7   :  { %v155_v1 = vmul.f32 10.0, %v154_v62 }
  0xb8   :  { %v170_v61 = vpop.eup %169 }
  0xb9   :  { %v149_v63 = vmul.f32 0.6931472, %v170_v61 }
  0xbb   :  { %v150_v0 = vmul.f32 0.4342945, %v149_v63 }
  0xbd   :  { %v151_v2 = vmul.f32 20.0, %v150_v0 }
  0xbf   :  { %v156_v3 = vsub.f32 %v151_v2, %v155_v1 }
  0xc1   :  { %158 = vst.msk [vmem:[%s270_s2] sm:$0x3] %vm128_vm1, %v156_v3 }
  0xc2   :  { %163 = vsyncpa [#allocation5], 1 }
  0xc3   :  { %164 = vsyncpa [#allocation7], 1 }

</bundles_post_ra>
